<compile_context>
chip_gen: v7x
topology: tpu7x:2x2x1
jax: 0.10.0
libtpu: 0.0.40
codegen_flags: <defaults>
</compile_context>

<pallas_src>
import functools

import jax
import jax.numpy as jnp
import numpy as np
from jax.experimental import pallas as pl
from jax.experimental.pallas import tpu as pltpu


def _round_up(x, m):
    return ((x + m - 1) // m) * m


def _qatt_kernel(x_ref, mask_ref, w1_ref, b1_ref, w2_ref, b2_ref, *out_refs,
                 return_att):
    """One batch-block of the QAtt forward.

    x_ref    : (BN, T, D) f32   question features (T padded to a multiple of 8)
    mask_ref : (BN, T)    f32   padding mask (nonzero = masked -> -1e9)
    w1_ref   : (D, H),  b1_ref : (1, H)
    w2_ref   : (H, G),  b2_ref : (1, G)
    out_refs : [att_ref (BN, G, T) if return_att], feat_ref (BN, G*D)
    """
    if return_att:
        att_ref, feat_ref = out_refs
    else:
        att_ref = None
        feat_ref = out_refs[0]

    x = x_ref[...]                               # (BN, T, D)
    BN, T, D = x.shape
    H = w1_ref.shape[1]
    G = w2_ref.shape[1]

    # ---- Linear 1 on the MXU: one large-M (BN*T, D) @ (D, H) matmul ---------
    # The (BN, T, D) -> (BN*T, D) merge is layout-preserving because T % 8 == 0.
    x2d = x.reshape(BN * T, D)
    h = jnp.dot(x2d, w1_ref[...], preferred_element_type=jnp.float32) + b1_ref[...]
    h = jnp.maximum(h, 0.0)                      # ReLU; dropout = identity (eval)
    h3 = h.reshape(BN, T, H)                     # layout-preserving (T % 8 == 0)

    mask = mask_ref[...]                         # (BN, T): 0 = keep, !=0 = masked
    w2v = w2_ref[...]                            # (H, G)
    b2v = b2_ref[...]                            # (1, G)
    neg_big = jnp.float32(-1e9)

    # ---- Linear 2 (H -> G=2) off the MXU + per-glimpse masked softmax -------
    # A 2-wide MXU output would use 2/256 lanes and drag lane-sparse tiles around;
    # VPU multiply + lane reduce runs in slots the first matmul doesn't saturate.
    atts = []
    for g in range(G):                           # G is static (2)
        w2col = w2v[:, g][None, None, :]         # (1, 1, H)
        lg = jnp.sum(h3 * w2col, axis=-1) + b2v[:, g:g + 1]      # (BN, T)
        lg = jnp.where(mask != 0.0, neg_big, lg)                 # masked_fill
        mx = jnp.max(lg, axis=-1, keepdims=True)
        e = jnp.exp(lg - mx)
        att_g = e / jnp.sum(e, axis=-1, keepdims=True)           # exact division
        atts.append(att_g)
        if att_ref is not None:
            # (N, G, T) layout: contiguous per-glimpse rows (lane-dense store);
            # wrapper transposes back to the API (N, T, G) shape.
            att_ref[:, g:g + 1, :] = att_g[:, None, :]

    # ---- Glimpse pooling: single pass over x, unrolled over T (VPU FMAs) ----
    # feat[n, g*D + d] = sum_t att_g[n, t] * x[n, t, d]
    accs = [jnp.zeros((BN, D), dtype=jnp.float32) for _ in range(G)]
    for t in range(T):                           # T static and small
        x_t = x[:, t, :]                         # (BN, D): read x once per t
        for g in range(G):
            accs[g] = accs[g] + atts[g][:, t:t + 1] * x_t
    # Single lane-dense slab store: both glimpses in contiguous lane ranges.
    feat_ref[...] = jnp.concatenate(accs, axis=-1)               # (BN, G*D)


@functools.partial(jax.jit, static_argnames=("block_n", "return_att"))
def qatt_forward(ques_feat, ques_feat_mask, w1, b1, w2, b2, *,
                 block_n=128, return_att=True):
    N, T, D = ques_feat.shape
    H = w1.shape[1]
    G = w2.shape[1]

    x = ques_feat.astype(jnp.float32)
    if ques_feat_mask is None:
        mask2d = jnp.zeros((N, T), dtype=jnp.float32)
    else:
        mask2d = (ques_feat_mask.reshape(N, T) != 0).astype(jnp.float32)

    # Pad T to a multiple of 8 (pad tokens masked) so in-kernel reshapes stay free.
    T_pad = max(8, _round_up(T, 8))
    if T_pad != T:
        x = jnp.pad(x, ((0, 0), (0, T_pad - T), (0, 0)))
        mask2d = jnp.pad(mask2d, ((0, 0), (0, T_pad - T)), constant_values=1.0)

    # Batch block.  v5e/v6e: block_n 256-512 amortizes per-step overhead best;
    # v7x (64 MiB VMEM, 2 TCs): keep block_n ~128 and pick bn <= N/2 when possible
    # so ("parallel",) can actually shard the batch over both cores.
    bn = max(1, min(block_n, N))
    N_pad = _round_up(N, bn)
    if N_pad != N:
        # Pad rows are fully masked -> uniform softmax, finite everywhere.
        x = jnp.pad(x, ((0, N_pad - N), (0, 0), (0, 0)))
        mask2d = jnp.pad(mask2d, ((0, N_pad - N), (0, 0)), constant_values=1.0)

    grid = (N_pad // bn,)

    # Per-block VMEM estimate (double-buffered inputs/outputs + h temps), with 2x
    # headroom, clamped to [32 MiB, 96 MiB].  On v7x keep the result <= ~48 MiB by
    # choosing block_n accordingly.
    est = 4 * (2 * bn * T_pad * D                 # x tiles
               + 2 * bn * T_pad                   # mask tiles
               + 2 * (D * H + H + H * G + G)      # weights / biases
               + 3 * bn * T_pad * H               # h + elementwise temps
               + 2 * bn * G * T_pad               # att out tiles
               + 2 * bn * G * D)                  # feat out tiles
    vmem_limit = int(min(96 * 1024 * 1024, max(32 * 1024 * 1024, 2 * est)))

    in_specs = [
        pl.BlockSpec((bn, T_pad, D), lambda i: (i, 0, 0)),   # x: tiled over batch
        pl.BlockSpec((bn, T_pad), lambda i: (i, 0)),         # slim f32 mask
        pl.BlockSpec((D, H), lambda i: (0, 0)),              # w1: VMEM-resident
        pl.BlockSpec((1, H), lambda i: (0, 0)),              # b1
        pl.BlockSpec((H, G), lambda i: (0, 0)),              # w2
        pl.BlockSpec((1, G), lambda i: (0, 0)),              # b2
    ]
    out_specs = []
    out_shapes = []
    if return_att:
        out_specs.append(pl.BlockSpec((bn, G, T_pad), lambda i: (i, 0, 0)))
        out_shapes.append(jax.ShapeDtypeStruct((N_pad, G, T_pad), jnp.float32))
    out_specs.append(pl.BlockSpec((bn, G * D), lambda i: (i, 0)))
    out_shapes.append(jax.ShapeDtypeStruct((N_pad, G * D), jnp.float32))

    outs = pl.pallas_call(
        functools.partial(_qatt_kernel, return_att=return_att),
        grid=grid,
        in_specs=in_specs,
        out_specs=tuple(out_specs),
        out_shape=tuple(out_shapes),
        compiler_params=pltpu.CompilerParams(
            dimension_semantics=("parallel",),
            vmem_limit_bytes=vmem_limit,
        ),
    )(x, mask2d, w1, b1, w2, b2)

    feat = outs[-1][:N]                                      # (N, G*D), glimpse-major
    if return_att:
        att = jnp.transpose(outs[0][:N, :, :T], (0, 2, 1))   # (N, T, G)
        return att, feat
    return feat


def qatt_reference(x, mask, w1, b1, w2, b2):
    """Pure-JAX reference mirroring the PyTorch forward."""
    N, T, D = x.shape
    G = w2.shape[1]
    h = jnp.maximum(x.reshape(N * T, D) @ w1 + b1, 0.0)
    logits = (h @ w2 + b2).reshape(N, T, G)
    logits = jnp.where(mask != 0, -1e9, logits)
    att = jax.nn.softmax(logits, axis=1)
    feat = jnp.einsum('ntg,ntd->ngd', att, x).reshape(N, G * D)
    return att, feat


if __name__ == "__main__":
    # Small, forward-consistent config: LSTM_OUT_SIZE=32, HIDDEN_SIZE=64, Q_GLIMPSES=2
    N, T, D, H, G = 2, 8, 32, 64, 2

    key = jax.random.PRNGKey(0)
    k_x, k_w1, k_b1, k_w2, k_b2 = jax.random.split(key, 5)

    ques_feat = jax.random.normal(k_x, (N, T, D), dtype=jnp.float32)

    # Deterministic padding mask: batch 0 masks last 2 steps, batch 1 masks last 3.
    valid_len = jnp.array([T - 2, T - 3], dtype=jnp.int32)
    t_idx = jnp.arange(T, dtype=jnp.int32)[None, :]
    ques_feat_mask = (t_idx >= valid_len[:, None]).astype(jnp.int32)[:, :, None]  # (N, T, 1)

    # MLP parameters (deterministic init). Weights stored as (in, out): y = x @ W + b.
    w1 = jax.random.normal(k_w1, (D, H), dtype=jnp.float32) * (1.0 / np.sqrt(D))
    b1 = jax.random.normal(k_b1, (1, H), dtype=jnp.float32) * 0.01
    w2 = jax.random.normal(k_w2, (H, G), dtype=jnp.float32) * (1.0 / np.sqrt(H))
    b2 = jax.random.normal(k_b2, (1, G), dtype=jnp.float32) * 0.01

    att, qatt_feat = qatt_forward(ques_feat, ques_feat_mask, w1, b1, w2, b2)
    jax.block_until_ready((att, qatt_feat))

    # Check vs pure-JAX reference (mirrors the PyTorch softmax-normalization assert too).
    att_ref, feat_ref = qatt_reference(ques_feat, ques_feat_mask, w1, b1, w2, b2)
    np.testing.assert_allclose(np.asarray(att), np.asarray(att_ref), rtol=1e-5, atol=1e-5)
    np.testing.assert_allclose(np.asarray(qatt_feat), np.asarray(feat_ref), rtol=1e-5, atol=1e-5)
    assert int(round(float(jnp.sum(att)))) == att.shape[0] * att.shape[2]
    assert qatt_feat.shape == (N, D * G)

    print("KERNEL_OK")
</pallas_src>

<mosaic_0001>
module attributes {stable_mosaic.version = 11 : i64} {
  func.func @_qatt_kernel(%arg0: i32, %arg1: memref<2x8x32xf32, #tpu.memory_space<vmem>>, %arg2: memref<2x8xf32, #tpu.memory_space<vmem>>, %arg3: memref<32x64xf32, #tpu.memory_space<vmem>>, %arg4: memref<1x64xf32, #tpu.memory_space<vmem>>, %arg5: memref<64x2xf32, #tpu.memory_space<vmem>>, %arg6: memref<1x2xf32, #tpu.memory_space<vmem>>, %arg7: memref<2x2x8xf32, #tpu.memory_space<vmem>>, %arg8: memref<2x64xf32, #tpu.memory_space<vmem>>) attributes {dimension_semantics = [#tpu.dimension_semantics<parallel>], iteration_bounds = array<i64: 1>, scalar_prefetch = 0 : i64, scratch_operands = 0 : i64, tpu.core_type = #tpu.core_type<tc>, window_params = [{transform_indices = @transform_0, window_bounds = array<i64: 2, 8, 32>}, {transform_indices = @transform_1, window_bounds = array<i64: 2, 8>}, {pipeline_mode = #tpu.pipeline_mode<synchronous>, transform_indices = @transform_2, window_bounds = array<i64: 32, 64>}, {pipeline_mode = #tpu.pipeline_mode<synchronous>, transform_indices = @transform_3, window_bounds = array<i64: 1, 64>}, {pipeline_mode = #tpu.pipeline_mode<synchronous>, transform_indices = @transform_4, window_bounds = array<i64: 64, 2>}, {pipeline_mode = #tpu.pipeline_mode<synchronous>, transform_indices = @transform_5, window_bounds = array<i64: 1, 2>}, {transform_indices = @transform_6, window_bounds = array<i64: 2, 2, 8>}, {transform_indices = @transform_7, window_bounds = array<i64: 2, 64>}]} {
    %c0 = arith.constant 0 : index
    %c0_0 = arith.constant 0 : index
    %c0_1 = arith.constant 0 : index
    %0 = vector.load %arg1[%c0, %c0_0, %c0_1] : memref<2x8x32xf32, #tpu.memory_space<vmem>>, vector<2x8x32xf32>
    %1 = vector.shape_cast %0 : vector<2x8x32xf32> to vector<16x32xf32>
    %c0_2 = arith.constant 0 : index
    %c0_3 = arith.constant 0 : index
    %2 = vector.load %arg3[%c0_2, %c0_3] : memref<32x64xf32, #tpu.memory_space<vmem>>, vector<32x64xf32>
    %cst = arith.constant dense<0.000000e+00> : vector<16x64xf32>
    %3 = tpu.matmul %1, %2, %cst {dimension_numbers = #tpu.dot_dimension_numbers<[1], [0], [0], [1], [0, 0, 1, 1], [], []>} : vector<16x32xf32>, vector<32x64xf32>, vector<16x64xf32> -> vector<16x64xf32>
    %c0_4 = arith.constant 0 : index
    %c0_5 = arith.constant 0 : index
    %4 = vector.load %arg4[%c0_4, %c0_5] : memref<1x64xf32, #tpu.memory_space<vmem>>, vector<1x64xf32>
    %5 = vector.broadcast %4 : vector<1x64xf32> to vector<16x64xf32>
    %6 = arith.addf %3, %5 : vector<16x64xf32>
    %cst_6 = arith.constant 0.000000e+00 : f32
    %7 = vector.broadcast %cst_6 : f32 to vector<16x64xf32>
    %8 = arith.maximumf %6, %7 : vector<16x64xf32>
    %9 = vector.shape_cast %8 : vector<16x64xf32> to vector<2x8x64xf32>
    %c0_7 = arith.constant 0 : index
    %c0_8 = arith.constant 0 : index
    %10 = vector.load %arg2[%c0_7, %c0_8] : memref<2x8xf32, #tpu.memory_space<vmem>>, vector<2x8xf32>
    %c0_9 = arith.constant 0 : index
    %c0_10 = arith.constant 0 : index
    %11 = vector.load %arg5[%c0_9, %c0_10] : memref<64x2xf32, #tpu.memory_space<vmem>>, vector<64x2xf32>
    %c0_11 = arith.constant 0 : index
    %c0_12 = arith.constant 0 : index
    %12 = vector.load %arg6[%c0_11, %c0_12] : memref<1x2xf32, #tpu.memory_space<vmem>>, vector<1x2xf32>
    %13 = vector.extract_strided_slice %11 {offsets = [0, 0], sizes = [64, 1], strides = [1, 1]} : vector<64x2xf32> to vector<64x1xf32>
    %14 = vector.shape_cast %13 : vector<64x1xf32> to vector<64xf32>
    %15 = vector.shape_cast %14 : vector<64xf32> to vector<1x1x64xf32>
    %16 = vector.broadcast %15 : vector<1x1x64xf32> to vector<2x8x64xf32>
    %17 = arith.mulf %9, %16 : vector<2x8x64xf32>
    %cst_13 = arith.constant dense<0.000000e+00> : vector<2x8xf32>
    %18 = vector.multi_reduction <add>, %17, %cst_13 [2] : vector<2x8x64xf32> to vector<2x8xf32>
    %19 = vector.extract_strided_slice %12 {offsets = [0, 0], sizes = [1, 1], strides = [1, 1]} : vector<1x2xf32> to vector<1x1xf32>
    %20 = vector.broadcast %19 : vector<1x1xf32> to vector<2x8xf32>
    %21 = arith.addf %18, %20 : vector<2x8xf32>
    %cst_14 = arith.constant 0.000000e+00 : f32
    %22 = vector.broadcast %cst_14 : f32 to vector<2x8xf32>
    %23 = arith.cmpf one, %10, %22 : vector<2x8xf32>
    %cst_15 = arith.constant -1.000000e+09 : f32
    %24 = vector.broadcast %cst_15 : f32 to vector<2x8xf32>
    %25 = arith.select %23, %24, %21 : vector<2x8xi1>, vector<2x8xf32>
    %cst_16 = arith.constant dense<0xFF800000> : vector<2xf32>
    %26 = vector.multi_reduction <maximumf>, %25, %cst_16 [1] : vector<2x8xf32> to vector<2xf32>
    %27 = vector.shape_cast %26 : vector<2xf32> to vector<2x1xf32>
    %28 = vector.broadcast %27 : vector<2x1xf32> to vector<2x8xf32>
    %29 = arith.subf %25, %28 : vector<2x8xf32>
    %30 = math.exp %29 : vector<2x8xf32>
    %cst_17 = arith.constant dense<0.000000e+00> : vector<2xf32>
    %31 = vector.multi_reduction <add>, %30, %cst_17 [1] : vector<2x8xf32> to vector<2xf32>
    %32 = vector.shape_cast %31 : vector<2xf32> to vector<2x1xf32>
    %33 = vector.broadcast %32 : vector<2x1xf32> to vector<2x8xf32>
    %34 = arith.divf %30, %33 : vector<2x8xf32>
    %35 = vector.shape_cast %34 : vector<2x8xf32> to vector<2x1x8xf32>
    %c0_18 = arith.constant 0 : index
    %c0_19 = arith.constant 0 : index
    %c0_20 = arith.constant 0 : index
    %36 = vector.load %arg7[%c0_18, %c0_19, %c0_20] : memref<2x2x8xf32, #tpu.memory_space<vmem>>, vector<2x1x8xf32>
    tpu.vector_store %arg7[%c0_18, %c0_19, %c0_20], %35 {strides = array<i32>} : memref<2x2x8xf32, #tpu.memory_space<vmem>>, vector<2x1x8xf32>,
    %37 = vector.extract_strided_slice %11 {offsets = [0, 1], sizes = [64, 1], strides = [1, 1]} : vector<64x2xf32> to vector<64x1xf32>
    %38 = vector.shape_cast %37 : vector<64x1xf32> to vector<64xf32>
    %39 = vector.shape_cast %38 : vector<64xf32> to vector<1x1x64xf32>
    %40 = vector.broadcast %39 : vector<1x1x64xf32> to vector<2x8x64xf32>
    %41 = arith.mulf %9, %40 : vector<2x8x64xf32>
    %cst_21 = arith.constant dense<0.000000e+00> : vector<2x8xf32>
    %42 = vector.multi_reduction <add>, %41, %cst_21 [2] : vector<2x8x64xf32> to vector<2x8xf32>
    %43 = vector.extract_strided_slice %12 {offsets = [0, 1], sizes = [1, 1], strides = [1, 1]} : vector<1x2xf32> to vector<1x1xf32>
    %44 = vector.broadcast %43 : vector<1x1xf32> to vector<2x8xf32>
    %45 = arith.addf %42, %44 : vector<2x8xf32>
    %cst_22 = arith.constant 0.000000e+00 : f32
    %46 = vector.broadcast %cst_22 : f32 to vector<2x8xf32>
    %47 = arith.cmpf one, %10, %46 : vector<2x8xf32>
    %cst_23 = arith.constant -1.000000e+09 : f32
    %48 = vector.broadcast %cst_23 : f32 to vector<2x8xf32>
    %49 = arith.select %47, %48, %45 : vector<2x8xi1>, vector<2x8xf32>
    %cst_24 = arith.constant dense<0xFF800000> : vector<2xf32>
    %50 = vector.multi_reduction <maximumf>, %49, %cst_24 [1] : vector<2x8xf32> to vector<2xf32>
    %51 = vector.shape_cast %50 : vector<2xf32> to vector<2x1xf32>
    %52 = vector.broadcast %51 : vector<2x1xf32> to vector<2x8xf32>
    %53 = arith.subf %49, %52 : vector<2x8xf32>
    %54 = math.exp %53 : vector<2x8xf32>
    %cst_25 = arith.constant dense<0.000000e+00> : vector<2xf32>
    %55 = vector.multi_reduction <add>, %54, %cst_25 [1] : vector<2x8xf32> to vector<2xf32>
    %56 = vector.shape_cast %55 : vector<2xf32> to vector<2x1xf32>
    %57 = vector.broadcast %56 : vector<2x1xf32> to vector<2x8xf32>
    %58 = arith.divf %54, %57 : vector<2x8xf32>
    %59 = vector.shape_cast %58 : vector<2x8xf32> to vector<2x1x8xf32>
    %c0_26 = arith.constant 0 : index
    %c1 = arith.constant 1 : index
    %c0_27 = arith.constant 0 : index
    %60 = vector.load %arg7[%c0_26, %c1, %c0_27] : memref<2x2x8xf32, #tpu.memory_space<vmem>>, vector<2x1x8xf32>
    tpu.vector_store %arg7[%c0_26, %c1, %c0_27], %59 {strides = array<i32>} : memref<2x2x8xf32, #tpu.memory_space<vmem>>, vector<2x1x8xf32>,
    %cst_28 = arith.constant 0.000000e+00 : f32
    %61 = vector.broadcast %cst_28 : f32 to vector<2x32xf32>
    %cst_29 = arith.constant 0.000000e+00 : f32
    %62 = vector.broadcast %cst_29 : f32 to vector<2x32xf32>
    %63 = vector.extract_strided_slice %0 {offsets = [0, 0, 0], sizes = [2, 1, 32], strides = [1, 1, 1]} : vector<2x8x32xf32> to vector<2x1x32xf32>
    %64 = vector.shape_cast %63 : vector<2x1x32xf32> to vector<2x32xf32>
    %65 = vector.extract_strided_slice %34 {offsets = [0, 0], sizes = [2, 1], strides = [1, 1]} : vector<2x8xf32> to vector<2x1xf32>
    %66 = vector.broadcast %65 : vector<2x1xf32> to vector<2x32xf32>
    %67 = arith.mulf %66, %64 : vector<2x32xf32>
    %68 = arith.addf %61, %67 : vector<2x32xf32>
    %69 = vector.extract_strided_slice %58 {offsets = [0, 0], sizes = [2, 1], strides = [1, 1]} : vector<2x8xf32> to vector<2x1xf32>
    %70 = vector.broadcast %69 : vector<2x1xf32> to vector<2x32xf32>
    %71 = arith.mulf %70, %64 : vector<2x32xf32>
    %72 = arith.addf %62, %71 : vector<2x32xf32>
    %73 = vector.extract_strided_slice %0 {offsets = [0, 1, 0], sizes = [2, 1, 32], strides = [1, 1, 1]} : vector<2x8x32xf32> to vector<2x1x32xf32>
    %74 = vector.shape_cast %73 : vector<2x1x32xf32> to vector<2x32xf32>
    %75 = vector.extract_strided_slice %34 {offsets = [0, 1], sizes = [2, 1], strides = [1, 1]} : vector<2x8xf32> to vector<2x1xf32>
    %76 = vector.broadcast %75 : vector<2x1xf32> to vector<2x32xf32>
    %77 = arith.mulf %76, %74 : vector<2x32xf32>
    %78 = arith.addf %68, %77 : vector<2x32xf32>
    %79 = vector.extract_strided_slice %58 {offsets = [0, 1], sizes = [2, 1], strides = [1, 1]} : vector<2x8xf32> to vector<2x1xf32>
    %80 = vector.broadcast %79 : vector<2x1xf32> to vector<2x32xf32>
    %81 = arith.mulf %80, %74 : vector<2x32xf32>
    %82 = arith.addf %72, %81 : vector<2x32xf32>
    %83 = vector.extract_strided_slice %0 {offsets = [0, 2, 0], sizes = [2, 1, 32], strides = [1, 1, 1]} : vector<2x8x32xf32> to vector<2x1x32xf32>
    %84 = vector.shape_cast %83 : vector<2x1x32xf32> to vector<2x32xf32>
    %85 = vector.extract_strided_slice %34 {offsets = [0, 2], sizes = [2, 1], strides = [1, 1]} : vector<2x8xf32> to vector<2x1xf32>
    %86 = vector.broadcast %85 : vector<2x1xf32> to vector<2x32xf32>
    %87 = arith.mulf %86, %84 : vector<2x32xf32>
    %88 = arith.addf %78, %87 : vector<2x32xf32>
    %89 = vector.extract_strided_slice %58 {offsets = [0, 2], sizes = [2, 1], strides = [1, 1]} : vector<2x8xf32> to vector<2x1xf32>
    %90 = vector.broadcast %89 : vector<2x1xf32> to vector<2x32xf32>
    %91 = arith.mulf %90, %84 : vector<2x32xf32>
    %92 = arith.addf %82, %91 : vector<2x32xf32>
    %93 = vector.extract_strided_slice %0 {offsets = [0, 3, 0], sizes = [2, 1, 32], strides = [1, 1, 1]} : vector<2x8x32xf32> to vector<2x1x32xf32>
    %94 = vector.shape_cast %93 : vector<2x1x32xf32> to vector<2x32xf32>
    %95 = vector.extract_strided_slice %34 {offsets = [0, 3], sizes = [2, 1], strides = [1, 1]} : vector<2x8xf32> to vector<2x1xf32>
    %96 = vector.broadcast %95 : vector<2x1xf32> to vector<2x32xf32>
    %97 = arith.mulf %96, %94 : vector<2x32xf32>
    %98 = arith.addf %88, %97 : vector<2x32xf32>
    %99 = vector.extract_strided_slice %58 {offsets = [0, 3], sizes = [2, 1], strides = [1, 1]} : vector<2x8xf32> to vector<2x1xf32>
    %100 = vector.broadcast %99 : vector<2x1xf32> to vector<2x32xf32>
    %101 = arith.mulf %100, %94 : vector<2x32xf32>
    %102 = arith.addf %92, %101 : vector<2x32xf32>
    %103 = vector.extract_strided_slice %0 {offsets = [0, 4, 0], sizes = [2, 1, 32], strides = [1, 1, 1]} : vector<2x8x32xf32> to vector<2x1x32xf32>
    %104 = vector.shape_cast %103 : vector<2x1x32xf32> to vector<2x32xf32>
    %105 = vector.extract_strided_slice %34 {offsets = [0, 4], sizes = [2, 1], strides = [1, 1]} : vector<2x8xf32> to vector<2x1xf32>
    %106 = vector.broadcast %105 : vector<2x1xf32> to vector<2x32xf32>
    %107 = arith.mulf %106, %104 : vector<2x32xf32>
    %108 = arith.addf %98, %107 : vector<2x32xf32>
    %109 = vector.extract_strided_slice %58 {offsets = [0, 4], sizes = [2, 1], strides = [1, 1]} : vector<2x8xf32> to vector<2x1xf32>
    %110 = vector.broadcast %109 : vector<2x1xf32> to vector<2x32xf32>
    %111 = arith.mulf %110, %104 : vector<2x32xf32>
    %112 = arith.addf %102, %111 : vector<2x32xf32>
    %113 = vector.extract_strided_slice %0 {offsets = [0, 5, 0], sizes = [2, 1, 32], strides = [1, 1, 1]} : vector<2x8x32xf32> to vector<2x1x32xf32>
    %114 = vector.shape_cast %113 : vector<2x1x32xf32> to vector<2x32xf32>
    %115 = vector.extract_strided_slice %34 {offsets = [0, 5], sizes = [2, 1], strides = [1, 1]} : vector<2x8xf32> to vector<2x1xf32>
    %116 = vector.broadcast %115 : vector<2x1xf32> to vector<2x32xf32>
    %117 = arith.mulf %116, %114 : vector<2x32xf32>
    %118 = arith.addf %108, %117 : vector<2x32xf32>
    %119 = vector.extract_strided_slice %58 {offsets = [0, 5], sizes = [2, 1], strides = [1, 1]} : vector<2x8xf32> to vector<2x1xf32>
    %120 = vector.broadcast %119 : vector<2x1xf32> to vector<2x32xf32>
    %121 = arith.mulf %120, %114 : vector<2x32xf32>
    %122 = arith.addf %112, %121 : vector<2x32xf32>
    %123 = vector.extract_strided_slice %0 {offsets = [0, 6, 0], sizes = [2, 1, 32], strides = [1, 1, 1]} : vector<2x8x32xf32> to vector<2x1x32xf32>
    %124 = vector.shape_cast %123 : vector<2x1x32xf32> to vector<2x32xf32>
    %125 = vector.extract_strided_slice %34 {offsets = [0, 6], sizes = [2, 1], strides = [1, 1]} : vector<2x8xf32> to vector<2x1xf32>
    %126 = vector.broadcast %125 : vector<2x1xf32> to vector<2x32xf32>
    %127 = arith.mulf %126, %124 : vector<2x32xf32>
    %128 = arith.addf %118, %127 : vector<2x32xf32>
    %129 = vector.extract_strided_slice %58 {offsets = [0, 6], sizes = [2, 1], strides = [1, 1]} : vector<2x8xf32> to vector<2x1xf32>
    %130 = vector.broadcast %129 : vector<2x1xf32> to vector<2x32xf32>
    %131 = arith.mulf %130, %124 : vector<2x32xf32>
    %132 = arith.addf %122, %131 : vector<2x32xf32>
    %133 = vector.extract_strided_slice %0 {offsets = [0, 7, 0], sizes = [2, 1, 32], strides = [1, 1, 1]} : vector<2x8x32xf32> to vector<2x1x32xf32>
    %134 = vector.shape_cast %133 : vector<2x1x32xf32> to vector<2x32xf32>
    %135 = vector.extract_strided_slice %34 {offsets = [0, 7], sizes = [2, 1], strides = [1, 1]} : vector<2x8xf32> to vector<2x1xf32>
    %136 = vector.broadcast %135 : vector<2x1xf32> to vector<2x32xf32>
    %137 = arith.mulf %136, %134 : vector<2x32xf32>
    %138 = arith.addf %128, %137 : vector<2x32xf32>
    %139 = vector.extract_strided_slice %58 {offsets = [0, 7], sizes = [2, 1], strides = [1, 1]} : vector<2x8xf32> to vector<2x1xf32>
    %140 = vector.broadcast %139 : vector<2x1xf32> to vector<2x32xf32>
    %141 = arith.mulf %140, %134 : vector<2x32xf32>
    %142 = arith.addf %132, %141 : vector<2x32xf32>
    %143 = tpu.concatenate %138, %142 in 1 : vector<2x32xf32>, vector<2x32xf32> -> vector<2x64xf32>
    %c0_30 = arith.constant 0 : index
    %c0_31 = arith.constant 0 : index
    %144 = vector.load %arg8[%c0_30, %c0_31] : memref<2x64xf32, #tpu.memory_space<vmem>>, vector<2x64xf32>
    tpu.vector_store %arg8[%c0_30, %c0_31], %143 {strides = array<i32>} : memref<2x64xf32, #tpu.memory_space<vmem>>, vector<2x64xf32>,
    return
  }
  func.func @transform_0(%arg0: i32) -> (i32, i32, i32) {
    %c0_i32 = arith.constant 0 : i32
    %c0_i32_0 = arith.constant 0 : i32
    %c0_i32_1 = arith.constant 0 : i32
    return %arg0, %c0_i32, %c0_i32_0 : i32, i32, i32
  }
  func.func @transform_1(%arg0: i32) -> (i32, i32) {
    %c0_i32 = arith.constant 0 : i32
    %c0_i32_0 = arith.constant 0 : i32
    return %arg0, %c0_i32 : i32, i32
  }
  func.func @transform_2(%arg0: i32) -> (i32, i32) {
    %c0_i32 = arith.constant 0 : i32
    %c0_i32_0 = arith.constant 0 : i32
    %c0_i32_1 = arith.constant 0 : i32
    return %c0_i32, %c0_i32_0 : i32, i32
  }
  func.func @transform_3(%arg0: i32) -> (i32, i32) {
    %c0_i32 = arith.constant 0 : i32
    %c0_i32_0 = arith.constant 0 : i32
    %c0_i32_1 = arith.constant 0 : i32
    return %c0_i32, %c0_i32_0 : i32, i32
  }
  func.func @transform_4(%arg0: i32) -> (i32, i32) {
    %c0_i32 = arith.constant 0 : i32
    %c0_i32_0 = arith.constant 0 : i32
    %c0_i32_1 = arith.constant 0 : i32
    return %c0_i32, %c0_i32_0 : i32, i32
  }
  func.func @transform_5(%arg0: i32) -> (i32, i32) {
    %c0_i32 = arith.constant 0 : i32
    %c0_i32_0 = arith.constant 0 : i32
    %c0_i32_1 = arith.constant 0 : i32
    return %c0_i32, %c0_i32_0 : i32, i32
  }
  func.func @transform_6(%arg0: i32) -> (i32, i32, i32) {
    %c0_i32 = arith.constant 0 : i32
    %c0_i32_0 = arith.constant 0 : i32
    %c0_i32_1 = arith.constant 0 : i32
    return %arg0, %c0_i32, %c0_i32_0 : i32, i32, i32
  }
  func.func @transform_7(%arg0: i32) -> (i32, i32) {
    %c0_i32 = arith.constant 0 : i32
    %c0_i32_0 = arith.constant 0 : i32
    return %arg0, %c0_i32 : i32, i32
  }
}

</mosaic_0001>

<bundles_post_ra>
// kernel: qatt_forward.1
= control target key start
LH: loop header
LB: loop body
LE: loop exit
PB: predicated region body
PF: predicated region fallthrough
CT: control target
= control target key end

     0   :  { %13 = vsyncpa [#allocation3], 0  ;;  %vm40_vm0 = vcmask 261120   ;;  %v725_v6 = vmov 1   ;;  %s925_s0 = inlined_call_operand.vmem [shape: f32[2,8,32], index: 0, kind: input, shape index: {}]   ;;  %s926_s1 = inlined_call_operand.vmem [shape: f32[2,8], index: 1, kind: input, shape index: {}]   ;;  %s927_s2 = inlined_call_operand.vmem [shape: f32[32,64], index: 2, kind: input, shape index: {}]   ;;  %s928_s3 = inlined_call_operand.vmem [shape: f32[1,64], index: 3, kind: input, shape index: {}]   ;;  %s929_s4 = inlined_call_operand.vmem [shape: f32[64,2], index: 4, kind: input, shape index: {}]   ;;  %s930_s5 = inlined_call_operand.vmem [shape: f32[1,2], index: 5, kind: input, shape index: {}]   ;;  %s931_s6 = inlined_call_operand.hbm [shape: f32[2,2,8], index: 6, kind: output, shape index: {0}]   ;;  %s932_s7 = inlined_call_operand.hbm [shape: f32[2,64], index: 7, kind: output, shape index: {1}]  }
   0x1   :  { %v29_v0 = vld [vmem:[%s927_s2] sm:$0xff]  ;;  %v30_v1 = vld [vmem:[%s927_s2 + $0x8] sm:$0xff]  ;;  %v31_v2 = vld [vmem:[%s927_s2 + $0x10] sm:$0xff]  ;;  %650 = vset.pattern.permute.xlu1 %v725_v6  ;;  %649 = vset.pattern.permute.xlu0 %v725_v6 }
   0x2   :  { %v628_v3 = vpack.c.bf16 %v30_v1, %v29_v0  ;;  %v32_v4 = vld [vmem:[%s927_s2 + $0x18] sm:$0xff]  ;;  %v793_v5 = vld [vmem:[%s925_s0] sm:$0xff]  ;;  %v127_v8 = vld [vmem:[%s929_s4 + $0x10] sm:$0xff] }
   0x3   :  { %v632_v7 = vpack.c.bf16 %v32_v4, %v31_v2  ;;  %625 = vmatprep.mubr.msk.f32.mxu0 %vm40_vm0, %v793_v5  ;;  %v125_v9 = vld [vmem:[%s929_s4] sm:$0xff]  ;;  %316 = vperm.xlu1 %650, %v127_v8   ;;  %v128_v10 = vld [vmem:[%s929_s4 + $0x18] sm:$0xff] }
   0x4   :  { %629 = vmatprep.subr.bf16.mxu0 %v628_v3  ;;  %310 = vperm.xlu0 %649, %v125_v9  }
   0x5   :  { %631 = vmatpush3.bf16.msra.mxu0 %v628_v3 }
   0x6   :  { %14 = vsyncpa [#allocation5], 0  ;;  %633 = vmatprep.subr.bf16.mxu0 %v632_v7  ;;  %v126_v11 = vld [vmem:[%s929_s4 + $0x8] sm:$0xff]  ;;  %v129_v14 = vld [vmem:[%s929_s4 + $0x20] sm:$0xff]  ;;  %v726_v17 = vmov 0   ;;  %v166_v23 = vlaneseq  ;;  %vm177_vm1 = vcmask 130112  }
   0x7   :  { %319 = vperm.xlu1 %650, %v128_v10   ;;  %v814_v12 = vld [vmem:[%s925_s0 + $0x8] sm:$0xff]  ;;  %v132_v15 = vld [vmem:[%s929_s4 + $0x38] sm:$0xff]  ;;  %v131_v16 = vld [vmem:[%s929_s4 + $0x30] sm:$0xff]  ;;  %vm184_vm2 = vcmask 195712   ;;  %vm191_vm3 = vcmask 261312   ;;  %vm198_vm4 = vcmask 326912  }
   0x8   :  { %313 = vperm.xlu0 %649, %v126_v11   ;;  %v130_v13 = vld [vmem:[%s929_s4 + $0x28] sm:$0xff]  ;;  %v167_v25 = vand.u32 127, %v166_v23  ;;  %v835_v27 = vshrl.u32 %v166_v23, 7  ;;  %vm205_vm5 = vcmask 392512   ;;  %vm212_vm6 = vcmask 458112  }
   0x9   :  { %635 = vmatpush3.bf16.msra.mxu0 %v632_v7  ;;  %vm219_vm7 = vcmask 523712   ;;  %vm237_vm8 = vcmask 523264   ;;  %vm221_vm9 = vcmask 1041409   ;;  %vm269_vm11 = vcmask 58368  }
   0xa   :  { %v172_v28 = vadd.s32 4294967288, %v167_v25  ;;  %v179_v30 = vadd.s32 4294967280, %v167_v25  ;;  %v838_v32 = vsub.s32 %v167_v25, %v835_v27  ;;  %v186_v34 = vadd.s32 4294967272, %v167_v25 }
   0xb   :  { %325 = vperm.xlu1 %650, %v130_v13   ;;  %v193_v39 = vadd.s32 4294967264, %v167_v25  ;;  %v200_v46 = vadd.s32 4294967256, %v167_v25  ;;  %v207_v53 = vadd.s32 4294967248, %v167_v25  ;;  %v214_v60 = vadd.s32 4294967240, %v167_v25 }
   0xc   :  { %626 = vmatmul.mubr.msk.f32.vlgmr.msra.gmra.mrb[0].mxu0 %vm40_vm0, %v814_v12  ;;  %322 = vperm.xlu0 %649, %v129_v14   ;;  %v175_v33 = vsub.s32 %v172_v28, %v835_v27  ;;  %v182_v36 = vsub.s32 %v179_v30, %v835_v27  ;;  %v189_v43 = vsub.s32 %v186_v34, %v835_v27  ;;  %vm306_vm12 = vcmask 57344  }
   0xd   :  { %v196_v49 = vsub.s32 %v193_v39, %v835_v27  ;;  %v203_v56 = vsub.s32 %v200_v46, %v835_v27  ;;  %v210_v63 = vsub.s32 %v207_v53, %v835_v27  ;;  %v217_v7 = vsub.s32 %v214_v60, %v835_v27  ;;  %v610_v39 = vld [vmem:[%s930_s5] ss:$0 sm:$0xff] }
   0xf   :  { %331 = vperm.xlu1 %650, %v132_v15  }
  0x10   :  { %328 = vperm.xlu0 %649, %v131_v16  }
  0x13   :  { %652 = vset.pattern.permute.xlu1 %v726_v17 }
  0x14   :  { %146 = vperm.xlu1 %652, %v126_v11   ;;  %651 = vset.pattern.permute.xlu0 %v726_v17 }
  0x15   :  { %143 = vperm.xlu0 %651, %v125_v9  }
  0x18   :  { %149 = vperm.xlu1 %652, %v127_v8  }
  0x19   :  { %152 = vperm.xlu0 %651, %v128_v10  }
  0x1c   :  { %155 = vperm.xlu1 %652, %v129_v14  }
  0x1d   :  { %158 = vperm.xlu0 %651, %v130_v13   ;;  %v607_v13 = vld [vmem:[%s928_s3] ss:$0 sm:$0xff] }
  0x20   :  { %161 = vperm.xlu1 %652, %v131_v16  }
  0x21   :  { %164 = vperm.xlu0 %651, %v132_v15  }
  0x25   :  { %653 = vset.pattern.permute.xlu0 %v725_v6 }
  0x82   :  { %v317_v18 = vpop.permute.xlu1 %316 }
  0x83   :  { %v311_v19 = vpop.permute.xlu0 %310  ;;  %v345_v44 = vrot.slane %v317_v18, %v182_v36 }
  0x84   :  { %v336_v37 = vrot.slane %v311_v19, %v838_v32 }
  0x86   :  { %v320_v20 = vpop.permute.xlu1 %319 }
  0x87   :  { %v314_v21 = vpop.permute.xlu0 %313  ;;  %v350_v51 = vrot.slane %v320_v20, %v189_v43 }
  0x88   :  { %v340_v38 = vrot.slane %v314_v21, %v175_v33 }
  0x8a   :  { %v326_v22 = vpop.permute.xlu1 %325  ;;  %v341_v45 = vsel %vm177_vm1, %v340_v38, %v336_v37 }
  0x8b   :  { %v323_v24 = vpop.permute.xlu0 %322  ;;  %v346_v52 = vsel %vm184_vm2, %v345_v44, %v341_v45  ;;  %v360_v1 = vrot.slane %v326_v22, %v203_v56  ;;  %v124_v44 = vld [vmem:[%s926_s1] sm:$0x3]  ;;  %s734_s1 = smov [#allocation2]  }
  0x8c   :  { %v355_v58 = vrot.slane %v323_v24, %v196_v49  ;;  %v351_v59 = vsel %vm191_vm3, %v350_v51, %v346_v52  ;;  %vm255_vm10 = vcmp.ne.f32.partialorder %v124_v44, 0.0  ;;  %s582_s5 = sshll.u32 %s734_s1, 4  ;;  %s583_s5 = int_to_ptr.vmem [resolvable:$true] %s582_s5 }
  0x8d   :  { %s677_s8 = scalar_lea.vmem %s583_s5, 64  ;;  %p682_p1 = scmp.lt.s32.totalorder %s583_s5, %s583_s5 }
  0x8e   :  { %v833_v26 = vpop.permute.xlu1 %331  ;;  %v356_v2 = vsel %vm198_vm4, %v355_v58, %v351_v59  ;;  %p678_p0 = scmp.ne.s32.totalorder %s583_s5, %s677_s8  ;;  %p683_p2 = scmp.lt.s32.totalorder %s677_s8, %s677_s8 }
  0x8f   :  { %v329_v29 = vpop.permute.xlu0 %328  ;;  %v361_v10 = vsel %vm205_vm5, %v360_v1, %v356_v2  ;;  %v370_v16 = vrot.slane %v833_v26, %v217_v7 }
  0x90   :  { %v365_v9 = vrot.slane %v329_v29, %v210_v63  ;;  %p684_p3 = por %p683_p2, %p682_p1 }
  0x92   :  { %v366_v19 = vsel %vm212_vm6, %v365_v9, %v361_v10  ;;  %v727_v9 = vmov 1966171168   ;;  %p685_p4 = pnand %p684_p3, %p678_p0 }
  0x93   :  { %v147_v31 = vpop.permute.xlu1 %146  ;;  %v371_v29 = vsel %vm219_vm7, %v370_v16, %v366_v19  ;;  %v283_v10 = vunpack.c.l.s4 %v727_v9 }
  0x94   :  { %v144_v35 = vpop.permute.xlu0 %143  ;;  %v176_v40 = vrot.slane %v147_v31, %v175_v33 }
  0x95   :  { %v171_v41 = vrot.slane %v144_v35, %v838_v32 }
  0x97   :  { %v150_v42 = vpop.permute.xlu1 %149  ;;  %v178_v50 = vsel %vm177_vm1, %v176_v40, %v171_v41 }
  0x98   :  { %v183_v47 = vrot.slane %v150_v42, %v182_v36  ;;  %v153_v48 = vpop.permute.xlu0 %152 }
  0x99   :  { %v190_v54 = vrot.slane %v153_v48, %v189_v43 }
  0x9a   :  { %v185_v57 = vsel %vm184_vm2, %v183_v47, %v178_v50 }
  0x9b   :  { %v156_v55 = vpop.permute.xlu1 %155  ;;  %v192_v0 = vsel %vm191_vm3, %v190_v54, %v185_v57 }
  0x9c   :  { %v197_v61 = vrot.slane %v156_v55, %v196_v49  ;;  %v159_v62 = vpop.permute.xlu0 %158 }
  0x9d   :  { %v204_v3 = vrot.slane %v159_v62, %v203_v56 }
  0x9e   :  { %v199_v8 = vsel %vm198_vm4, %v197_v61, %v192_v0 }
  0x9f   :  { %v162_v4 = vpop.permute.xlu1 %161  ;;  %v206_v15 = vsel %vm205_vm5, %v204_v3, %v199_v8 }
  0xa0   :  { %v211_v11 = vrot.slane %v162_v4, %v210_v63  ;;  %v165_v14 = vpop.permute.xlu0 %164 }
  0xa1   :  { %v218_v21 = vrot.slane %v165_v14, %v217_v7 }
  0xa2   :  { %v213_v23 = vsel %vm212_vm6, %v211_v11, %v206_v15 }
  0xa3   :  { %v220_v31 = vsel %vm219_vm7, %v218_v21, %v213_v23  ;;  %v728_v23 = vmov 5  }
  0xdf   :  { %v627_v18 = vpop.f32.mrb[0].mxu0 }
  0xe0   :  { %v119_v20 = vadd.f32 %v627_v18, %v607_v13  ;;  %v113_v22 = vpop.f32.mrb[1].mxu0 }
  0xe1   :  { %v114_v24 = vadd.f32 %v607_v13, %v113_v22  ;;  %v284_v13 = vunpack.c.0.s8 %v283_v10 }
  0xe2   :  { %v123_v25 = vmax.f32 %v119_v20, 0.0 }
  0xe3   :  { %v122_v28 = vmax.f32 %v114_v24, 0.0  ;;  %v287_v14 = vsub.s32 %v284_v13, %v835_v27  ;;  %v729_v24 = vmov 2  }
  0xe4   :  { %v380_v30 = vmul.f32 %v371_v29, %v123_v25  ;;  %v236_v36 = vmul.f32 %v220_v31, %v123_v25 }
  0xe5   :  { %v379_v33 = vmul.f32 %v371_v29, %v122_v28  ;;  %v235_v37 = vmul.f32 %v220_v31, %v122_v28 }
  0xe6   :  { %v384_v34 = vsel %vm237_vm8, %v380_v30, 0.0  ;;  %v241_v26 = vsel %vm237_vm8, %v236_v36, 0.0  ;;  %v730_v30 = vmov 3   ;;  %v463_v36 = vrot.slane %v793_v5, 1 }
  0xe7   :  { %385 = vadd.xlane.f32.xlu0 %v384_v34  ;;  %v381_v35 = vsel %vm237_vm8, %v379_v33, 0.0  ;;  %v238_v38 = vsel %vm237_vm8, %v235_v37, 0.0  ;;  %v731_v33 = vmov 4   ;;  %v732_v34 = vmov 6  }
  0xe8   :  { %382 = vadd.xlane.f32.xlu1 %v381_v35  ;;  %v478_v37 = vrot.slane %v793_v5, 2 }
  0xec   :  { %242 = vadd.xlane.f32.xlu1 %v241_v26  ;;  %v448_v26 = vrot.slane %v814_v12, 7 }
  0xf0   :  { %239 = vadd.xlane.f32.xlu1 %v238_v38  ;;  %v479_v38 = vrot.slane %v814_v12, 1 }
  0xf2   :  { %v480_v44 = vsel %vm221_vm9, %v479_v38, %v478_v37 }
  0xfd   :  { %388 = vperm.xlu0 %653, %v610_v39  }
 0x101   :  { %250 = vperm.xlu1 %652, %v610_v39  }
 0x174   :  { %v386_v41 = vpop.xlane.xlu0 %385 }
 0x175   :  { %v383_v40 = vpop.xlane.xlu1 %382 }
 0x179   :  { %v243_v42 = vpop.xlane.xlu1 %242 }
 0x17c   :  { %v389_v43 = vpop.permute.xlu0 %388 }
 0x17d   :  { %v391_v45 = vadd.f32 %v389_v43, %v383_v40  ;;  %v392_v46 = vadd.f32 %v389_v43, %v386_v41  ;;  %v240_v47 = vpop.xlane.xlu1 %239  ;;  %v449_v40 = vsel %vm221_vm9, %v448_v26, %v793_v5  ;;  %v495_v43 = vrot.slane %v814_v12, 2 }
 0x17f   :  { %v398_v48 = vrot.slane %v391_v45, %v838_v32  ;;  %v402_v49 = vrot.slane %v392_v46, %v838_v32 }
 0x181   :  { %v251_v50 = vpop.permute.xlu1 %250  ;;  %v403_v51 = vsel %vm221_vm9, %v402_v49, %v398_v48  ;;  %v510_v48 = vrot.slane %v793_v5, 4  ;;  %v511_v49 = vrot.slane %v814_v12, 3 }
 0x182   :  { %v253_v52 = vadd.f32 %v251_v50, %v240_v47  ;;  %v254_v53 = vadd.f32 %v251_v50, %v243_v42  ;;  %v405_v54 = vsel %vm255_vm10, -1e+09, %v403_v51  ;;  %v494_v42 = vrot.slane %v793_v5, 3 }
 0x183   :  { %v406_v55 = vsel %vm269_vm11, %v405_v54, -inf }
 0x184   :  { %v261_v56 = vrot.slane %v253_v52, %v838_v32  ;;  %v265_v57 = vrot.slane %v254_v53, %v838_v32  ;;  %407 = vmax.xlane.f32.xlu1 %v406_v55  ;;  %v496_v47 = vsel %vm221_vm9, %v495_v43, %v494_v42  ;;  %v527_v55 = vrot.slane %v814_v12, 4 }
 0x186   :  { %v266_v58 = vsel %vm221_vm9, %v265_v57, %v261_v56  ;;  %v512_v56 = vsel %vm221_vm9, %v511_v49, %v510_v48 }
 0x187   :  { %v268_v59 = vsel %vm255_vm10, -1e+09, %v266_v58 }
 0x188   :  { %v270_v60 = vsel %vm269_vm11, %v268_v59, -inf }
 0x189   :  { %271 = vmax.xlane.f32.xlu0 %v270_v60  ;;  %v543_v60 = vrot.slane %v814_v12, 5 }
 0x211   :  { %v408_v61 = vpop.xlane.xlu1 %407 }
 0x212   :  { %v409_v62 = vsub.f32 %v405_v54, %v408_v61  ;;  %v526_v54 = vrot.slane %v793_v5, 5 }
 0x214   :  { %v410_v63 = vmul.f32 1.442695, %v409_v62 }
 0x216   :  { %669 = vpow2.f32 %v410_v63  ;;  %v272_v0 = vpop.xlane.xlu0 %271  ;;  %v528_v63 = vsel %vm221_vm9, %v527_v55, %v526_v54 }
 0x217   :  { %v273_v1 = vsub.f32 %v268_v59, %v272_v0  ;;  %v542_v59 = vrot.slane %v793_v5, 6 }
 0x219   :  { %v274_v2 = vmul.f32 1.442695, %v273_v1 }
 0x21b   :  { %671 = vpow2.f32 %v274_v2  ;;  %v544_v2 = vsel %vm221_vm9, %v543_v60, %v542_v59 }
 0x220   :  { %v670_v3 = vpop.eup %669 }
 0x221   :  { %v412_v4 = vsel %vm269_vm11, %v670_v3, 0.0 }
 0x222   :  { %413 = vadd.xlane.f32.xlu1 %v412_v4  ;;  %v559_v4 = vrot.slane %v814_v12, 6 }
 0x225   :  { %v672_v32 = vpop.eup %671 }
 0x226   :  { %v276_v7 = vsel %vm269_vm11, %v672_v32, 0.0 }
 0x227   :  { %277 = vadd.xlane.f32.xlu1 %v276_v7 }
 0x2af   :  { %v414_v8 = vpop.xlane.xlu1 %413 }
 0x2b0   :  { %673 = vrcp.f32 %v414_v8 }
 0x2b4   :  { %v278_v11 = vpop.xlane.xlu1 %277 }
 0x2b5   :  { %675 = vrcp.f32 %v278_v11 }
 0x2ba   :  { %v674_v15 = vpop.eup %673 }
 0x2bb   :  { %v416_v16 = vmul.f32 %v674_v15, %v670_v3  ;;  %v558_v3 = vrot.slane %v793_v5, 7 }
 0x2bd   :  { %469 = vperm.xlu0 %653, %v416_v16   ;;  %454 = vperm.xlu1 %652, %v416_v16   ;;  %v424_v18 = vrot.slane %v416_v16, %v287_v14 }
 0x2bf   :  { %v676_v19 = vpop.eup %675  ;;  %v425_v21 = vcombine.high %v424_v18, %v424_v18  ;;  %v432_v22 = vrot.slane %v424_v18, %v287_v14 }
 0x2c0   :  { %v280_v20 = vmul.f32 %v676_v19, %v672_v32 }
 0x2c1   :  { %657 = vset.pattern.permute.xlu0 %v728_v23  ;;  %654 = vset.pattern.permute.xlu1 %v729_v24  ;;  %v439_v28 = vrot.slane %v425_v21, %v287_v14  ;;  %442 = vst.msk [vmem:[#allocation2 + $0x1] sm:$0x1] %vm306_vm12, %v432_v22 }
 0x2c2   :  { %533 = vperm.xlu0 %657, %v416_v16   ;;  %485 = vperm.xlu1 %654, %v416_v16   ;;  %v288_v25 = vrot.slane %v280_v20, %v287_v14 }
 0x2c3   :  { %443 = vst.msk [vmem:[#allocation2 + $0x3] sm:$0x1] %vm306_vm12, %v439_v28 }
 0x2c4   :  { %v289_v27 = vcombine.high %v288_v25, %v288_v25  ;;  %v296_v29 = vrot.slane %v288_v25, %v287_v14 }
 0x2c6   :  { %660 = vset.pattern.permute.xlu0 %v726_v17  ;;  %655 = vset.pattern.permute.xlu1 %v730_v30  ;;  %v303_v31 = vrot.slane %v289_v27, %v287_v14  ;;  %307 = vst.msk [vmem:[#allocation2] sm:$0x1] %vm306_vm12, %v296_v29  ;;  %v733_v17 = vmov 7  }
 0x2c7   :  { %501 = vperm.xlu1 %655, %v416_v16   ;;  %445 = vperm.xlu0 %660, %v280_v20  }
 0x2c8   :  { %308 = vst.msk [vmem:[#allocation2 + $0x2] sm:$0x1] %vm306_vm12, %v303_v31 }
 0x2cb   :  { %656 = vset.pattern.permute.xlu1 %v731_v33  ;;  %663 = vset.pattern.permute.xlu0 %v730_v30 }
 0x2cc   :  { %517 = vperm.xlu1 %656, %v416_v16   ;;  %491 = vperm.xlu0 %663, %v280_v20  }
 0x2d0   :  { %658 = vset.pattern.permute.xlu1 %v732_v34  ;;  %666 = vset.pattern.permute.xlu0 %v732_v34 }
 0x2d1   :  { %549 = vperm.xlu1 %658, %v416_v16   ;;  %539 = vperm.xlu0 %666, %v280_v20  }
 0x2d5   :  { %659 = vset.pattern.permute.xlu1 %v733_v17  ;;  %668 = vset.pattern.permute.xlu0 %v733_v17 }
 0x2d6   :  { %565 = vperm.xlu1 %659, %v416_v16  }
 0x2da   :  { %661 = vset.pattern.permute.xlu1 %v725_v6  ;;  %v464_v6 = vsel %vm221_vm9, %v814_v12, %v463_v36 }
 0x2db   :  { %460 = vperm.xlu1 %661, %v280_v20  }
 0x2df   :  { %662 = vset.pattern.permute.xlu1 %v729_v24 }
 0x2e0   :  { %475 = vperm.xlu1 %662, %v280_v20  }
 0x2e4   :  { %664 = vset.pattern.permute.xlu1 %v731_v33 }
 0x2e5   :  { %507 = vperm.xlu1 %664, %v280_v20  }
 0x2e9   :  { %665 = vset.pattern.permute.xlu1 %v728_v23 }
 0x2ea   :  { %523 = vperm.xlu1 %665, %v280_v20  }
 0x2ee   :  { %667 = vset.pattern.permute.xlu1 %v733_v17 }
 0x2ef   :  { %555 = vperm.xlu1 %667, %v280_v20  }
 0x33c   :  { %v455_v35 = vpop.permute.xlu1 %454  ;;  %v470_v39 = vpop.permute.xlu0 %469 }
 0x33d   :  { %v472_v45 = vmul.f32 %v470_v39, %v464_v6  ;;  %v457_v46 = vmul.f32 %v455_v35, %v449_v40 }
 0x33f   :  { %v473_v52 = vadd.f32 %v472_v45, %v457_v46 }
 0x341   :  { %v486_v41 = vpop.permute.xlu1 %485  ;;  %v534_v0 = vpop.permute.xlu0 %533 }
 0x342   :  { %v488_v50 = vmul.f32 %v486_v41, %v480_v44  ;;  %v536_v32 = vmul.f32 %v534_v0, %v528_v63 }
 0x344   :  { %v489_v57 = vadd.f32 %v488_v50, %v473_v52 }
 0x346   :  { %v502_v51 = vpop.permute.xlu1 %501 }
 0x347   :  { %v504_v53 = vmul.f32 %v502_v51, %v496_v47 }
 0x349   :  { %v505_v61 = vadd.f32 %v504_v53, %v489_v57 }
 0x34b   :  { %v518_v58 = vpop.permute.xlu1 %517 }
 0x34c   :  { %v520_v62 = vmul.f32 %v518_v58, %v512_v56 }
 0x34e   :  { %v521_v1 = vadd.f32 %v520_v62, %v505_v61 }
 0x350   :  { %v550_v7 = vpop.permute.xlu1 %549 }
 0x351   :  { %688 = shalt.err (!%p685_p4)
}
 0x352   :  { %s689_s11 = scalar_lea.hbm %s931_s6, 64 }
 0x353   :  { %p690_p5 = scmp.ne.s32.totalorder %s931_s6, %s689_s11  ;;  %p693_p6 = scmp.lt.u32.totalorder %s689_s11, %s931_s6 }
 0x355   :  { %p695_p7 = pnand %p693_p6, %p690_p5 }
 0x357   :  { %698 = shalt.err (!%p695_p7)
}
 0x358   :  { %s735_s15 = smov 32   ;;  %s736_s16 = smov 2   ;;  %v537_v5 = vadd.f32 %v536_v32, %v521_v1  ;;  %v552_v12 = vmul.f32 %v550_v7, %v544_v2  ;;  %v560_v8 = vsel %vm221_vm9, %v559_v4, %v558_v3  ;;  %v566_v9 = vpop.permute.xlu1 %565  ;;  %v446_v13 = vpop.permute.xlu0 %445  ;;  %vm575_vm13 = vcmask 517120  }
 0x359   :  { %588 = dma.vmem_to_hbm [thread:$0]  %s583_s5, 64, %s931_s6, [#allocation3], %s735_s15, %s735_s15, %s736_s16   ;;  %v568_v11 = vmul.f32 %v566_v9, %v560_v8  ;;  %v451_v16 = vmul.f32 %v449_v40, %v446_v13 }
 0x35a   :  { %v553_v10 = vadd.f32 %v552_v12, %v537_v5  ;;  %s737_s6 = smov [#allocation4]  }
 0x35b   :  { %s595_s19 = sshll.u32 %s737_s6, 4  ;;  %s596_s19 = int_to_ptr.vmem [resolvable:$true] %s595_s19 }
 0x35c   :  { %v569_v14 = vadd.f32 %v568_v11, %v553_v10  ;;  %v461_v15 = vpop.permute.xlu1 %460  ;;  %v492_v20 = vpop.permute.xlu0 %491  ;;  %s699_s20 = scalar_lea.vmem %s596_s19, 32  ;;  %p704_p9 = scmp.lt.s32.totalorder %s596_s19, %s596_s19 }
 0x35d   :  { %v466_v18 = vmul.f32 %v464_v6, %v461_v15  ;;  %v498_v23 = vmul.f32 %v496_v47, %v492_v20  ;;  %p700_p8 = scmp.ne.s32.totalorder %s596_s19, %s699_s20  ;;  %p705_p10 = scmp.lt.s32.totalorder %s699_s20, %s699_s20 }
 0x35e   :  { %571 = vrot.lane.b32.xlu1 %v569_v14, %s735_s15 }
 0x35f   :  { %v467_v19 = vadd.f32 %v466_v18, %v451_v16  ;;  %p706_p11 = por %p705_p10, %p704_p9 }
 0x360   :  { %v476_v21 = vpop.permute.xlu1 %475  ;;  %v540_v30 = vpop.permute.xlu0 %539 }
 0x361   :  { %v482_v22 = vmul.f32 %v480_v44, %v476_v21  ;;  %v546_v34 = vmul.f32 %v544_v2, %v540_v30  ;;  %p707_p12 = pnand %p706_p11, %p700_p8 }
 0x363   :  { %v483_v24 = vadd.f32 %v482_v22, %v467_v19 }
 0x364   :  { %v508_v28 = vpop.permute.xlu1 %507 }
 0x365   :  { %v499_v25 = vadd.f32 %v498_v23, %v483_v24  ;;  %v514_v27 = vmul.f32 %v512_v56, %v508_v28 }
 0x367   :  { %v515_v29 = vadd.f32 %v514_v27, %v499_v25 }
 0x369   :  { %v524_v31 = vpop.permute.xlu1 %523 }
 0x36a   :  { %v530_v33 = vmul.f32 %v528_v63, %v524_v31 }
 0x36c   :  { %v531_v17 = vadd.f32 %v530_v33, %v515_v29 }
 0x36e   :  { %v547_v35 = vadd.f32 %v546_v34, %v531_v17  ;;  %v556_v36 = vpop.permute.xlu1 %555 }
 0x36f   :  { %v562_v26 = vmul.f32 %v560_v8, %v556_v36 }
 0x371   :  { %v563_v37 = vadd.f32 %v562_v26, %v547_v35 }
 0x3d0   :  { %v572_v38 = vpop.permute.xlu1 %571 }
 0x3d1   :  { %v574_v6 = vsel %vm40_vm0, %v563_v37, %v572_v38 }
 0x3d2   :  { %576 = vst.msk [vmem:[#allocation4] sm:$0x3] %vm575_vm13, %v574_v6 }
 0x3d3   :  { %710 = shalt.err (!%p707_p12)
}
 0x3d4   :  { %s711_s23 = scalar_lea.hbm %s932_s7, 32 }
 0x3d5   :  { %p712_p13 = scmp.ne.s32.totalorder %s932_s7, %s711_s23  ;;  %p715_p0 = scmp.lt.u32.totalorder %s711_s23, %s932_s7 }
 0x3d7   :  { %p717_p1 = pnand %p715_p0, %p712_p13 }
 0x3d9   :  { %720 = shalt.err (!%p717_p1)
}
 0x3da   :  { %598 = dma.vmem_to_hbm [thread:$0]  %s596_s19, 32, %s932_s7, [#allocation5]  }
 0x3db   :  { %721 = dma.done.wait [#allocation3], 64  }
 0x3dc   :  { %722 = vsyncadd [#allocation3], 4294967232 }
 0x3dd   :  { %723 = dma.done.wait [#allocation5], 32  }
 0x3de   :  { %724 = vsyncadd [#allocation5], 4294967264 }
 0x3df   :  { %605 = vsyncpa [#allocation3], 1 }
 0x3e0   :  { %606 = vsyncpa [#allocation5], 1 }

</bundles_post_ra>
